<compile_context>
chip_gen: v5e
topology: v5e:2x2
jax: 0.10.0
libtpu: 0.0.40
codegen_flags: <defaults>
</compile_context>

<pallas_src>
import jax
import jax.numpy as jnp
from jax.experimental import pallas as pl
from jax.experimental.pallas import tpu as pltpu

HIDDEN = 32
OUT = 10
HIDDEN_PAD = 128                       # pad hidden dim to a full vreg lane width
OUT_PAD = 128                          # lane-dense output (no masked vst.msk stores)

_TARGET_X_BYTES_PER_STEP = 4 << 20     # ~4 MiB of x per grid step (HBM-roofline regime)
_MIN_X_BYTES_PER_STEP = 2 << 20        # never shrink a step below ~2 MiB of x
_MIN_GRID_STEPS = 4                    # keep pipeline / v7x megacore split busy
_FALLBACK_VMEM = 64 << 20              # v7x per-TC physical VMEM (conservative default)


def _round_down8(n):
    return max(8, (int(n) // 8) * 8)


def _vmem_budget_bytes():
    """Generation-aware VMEM budget: ~75% of physical, capped at 100 MiB."""
    try:
        cap = int(pltpu.get_tpu_info().vmem_capacity_bytes)
        if cap <= 0:
            raise ValueError
    except Exception:
        cap = _FALLBACK_VMEM
    return min((cap * 3) // 4, 100 << 20)


def _choose_tile_b(B, D, x_itemsize, out_itemsize, vmem_budget):
    """Batch tile sized by bytes-per-step, capped by the VMEM budget."""
    # Resident (f32) weights/biases stay in VMEM across the whole grid.
    resident = 4 * (D * HIDDEN_PAD + HIDDEN_PAD + HIDDEN_PAD * OUT_PAD + OUT_PAD)
    # x tile and out tile are double-buffered by the BlockSpec pipeline.
    per_row = 2 * (x_itemsize * D + out_itemsize * OUT_PAD)
    vmem_rows = max(8, (vmem_budget - resident) // per_row)
    target_rows = max(8, _TARGET_X_BYTES_PER_STEP // (x_itemsize * D))
    tb = min(int(target_rows), int(vmem_rows))
    # Prefer >= _MIN_GRID_STEPS grid steps (pipelining + v7x two-core split), but
    # never push a step below ~2 MiB of x.
    min_rows = max(8, _MIN_X_BYTES_PER_STEP // (x_itemsize * D))
    tb = min(tb, max(int(min_rows), B // _MIN_GRID_STEPS))
    tb = _round_down8(tb)
    if tb >= B:
        return B                        # single full-batch tile (block == full array dim)
    return tb


def linear_head_kernel(x_ref, w1_ref, b1_ref, w2_ref, b2_ref, o_ref):
    # x_ref: (TB, D), w1_ref: (D, 128), b1_ref: (1, 128),
    # w2_ref: (128, 128), b2_ref: (1, 128), o_ref: (TB, 128)
    x = x_ref[...].astype(jnp.float32)
    h = jnp.dot(x, w1_ref[...], preferred_element_type=jnp.float32) + b1_ref[...]
    h = jnp.maximum(h, 0.0)             # ReLU (padded hidden columns stay exactly 0)
    y = jnp.dot(h, w2_ref[...], preferred_element_type=jnp.float32) + b2_ref[...]
    o_ref[...] = y.astype(o_ref.dtype)


def pad_params(w1, b1, w2, b2):
    """Pad weights/biases to lane-dense 128-wide shapes.  Call ONCE at init."""
    D = w1.shape[0]
    w1p = jnp.zeros((D, HIDDEN_PAD), jnp.float32).at[:, :HIDDEN].set(
        w1.astype(jnp.float32))
    b1p = jnp.zeros((1, HIDDEN_PAD), jnp.float32).at[:, :HIDDEN].set(
        b1.reshape(1, HIDDEN).astype(jnp.float32))
    w2p = jnp.zeros((HIDDEN_PAD, OUT_PAD), jnp.float32).at[:HIDDEN, :OUT].set(
        w2.astype(jnp.float32))
    b2p = jnp.zeros((1, OUT_PAD), jnp.float32).at[:, :OUT].set(
        b2.reshape(1, OUT).astype(jnp.float32))
    return w1p, b1p, w2p, b2p


def linear_head_padded(x, w1p, b1p, w2p, b2p, *, tile_b=None):
    """Forward pass with pre-padded params.  Returns (B, OUT) logits."""
    B, D = x.shape
    out_dtype = x.dtype                 # bf16 in -> bf16 out; f32 accumulation inside
    vmem_budget = _vmem_budget_bytes()
    tb = tile_b if tile_b is not None else _choose_tile_b(
        B, D, x.dtype.itemsize, jnp.dtype(out_dtype).itemsize, vmem_budget)
    grid = pl.cdiv(B, tb)               # ragged last tile handled by Pallas; no jnp.pad

    flops = 2 * B * D * HIDDEN_PAD + 2 * B * HIDDEN_PAD * OUT_PAD
    bytes_accessed = (B * D * x.dtype.itemsize
                      + 4 * (D * HIDDEN_PAD + HIDDEN_PAD + HIDDEN_PAD * OUT_PAD + OUT_PAD)
                      + B * OUT_PAD * jnp.dtype(out_dtype).itemsize)

    out = pl.pallas_call(
        linear_head_kernel,
        out_shape=jax.ShapeDtypeStruct((B, OUT_PAD), out_dtype),
        grid_spec=pltpu.PrefetchScalarGridSpec(
            num_scalar_prefetch=0,
            grid=(grid,),
            in_specs=[
                # x: streamed batch tiles
                pl.BlockSpec((tb, D), lambda i: (i, 0)),
                # weights / biases: constant index map -> VMEM-resident
                pl.BlockSpec((D, HIDDEN_PAD), lambda i: (0, 0)),
                pl.BlockSpec((1, HIDDEN_PAD), lambda i: (0, 0)),
                pl.BlockSpec((HIDDEN_PAD, OUT_PAD), lambda i: (0, 0)),
                pl.BlockSpec((1, OUT_PAD), lambda i: (0, 0)),
            ],
            out_specs=pl.BlockSpec((tb, OUT_PAD), lambda i: (i, 0)),
        ),
        compiler_params=pltpu.CompilerParams(
            dimension_semantics=("parallel",),   # megacore split on v7x; no-op v5e/v6e
            vmem_limit_bytes=int(vmem_budget),
        ),
        cost_estimate=pl.CostEstimate(
            flops=flops, transcendentals=0, bytes_accessed=bytes_accessed),
    )(x, w1p, b1p, w2p, b2p)

    # Padded logit columns are exactly 0; the column slice fuses into the
    # consumer when this wrapper is jitted.
    return out[:, :OUT]


def linear_head(x, w1, b1, w2, b2):
    """Convenience wrapper that pads params per call (prefer pad_params once)."""
    return linear_head_padded(x, *pad_params(w1, b1, w2, b2))


def init_params(key, input_dim):
    # Deterministic init mimicking nn.Linear's uniform(-1/sqrt(fan_in), 1/sqrt(fan_in)).
    k1, k2, k3, k4 = jax.random.split(key, 4)
    bound1 = 1.0 / jnp.sqrt(input_dim)
    bound2 = 1.0 / jnp.sqrt(HIDDEN)
    w1 = jax.random.uniform(k1, (input_dim, HIDDEN), jnp.float32, -bound1, bound1)
    b1 = jax.random.uniform(k2, (1, HIDDEN), jnp.float32, -bound1, bound1)
    w2 = jax.random.uniform(k3, (HIDDEN, OUT), jnp.float32, -bound2, bound2)
    b2 = jax.random.uniform(k4, (1, OUT), jnp.float32, -bound2, bound2)
    return w1, b1, w2, b2


def _reference(x, w1, b1, w2, b2):
    # f32-accumulated reference (matches the kernel's preferred_element_type=f32).
    h = jnp.maximum(
        jnp.dot(x, w1, precision=jax.lax.Precision.HIGHEST) + b1, 0.0)
    return jnp.dot(h, w2, precision=jax.lax.Precision.HIGHEST) + b2


if __name__ == "__main__":
    key = jax.random.PRNGKey(0)
    k_x, k_p, k_x2 = jax.random.split(key, 3)

    # Small shapes implied by forward(): x is (batch, input_dim); hidden=32, out=10.
    batch, input_dim = 16, 32
    x = jax.random.normal(k_x, (batch, input_dim), jnp.float32)
    w1, b1, w2, b2 = init_params(k_p, input_dim)
    padded = pad_params(w1, b1, w2, b2)          # pad ONCE at init

    fwd = jax.jit(linear_head_padded)            # column slice fuses under jit
    out = jax.block_until_ready(fwd(x, *padded))
    ref = _reference(x, w1, b1, w2, b2)
    assert out.shape == (batch, OUT)
    assert jnp.allclose(out, ref, atol=2e-4, rtol=2e-4)

    # Multi-step grid with a ragged last tile (no batch padding of x).
    batch2 = 200
    x2 = jax.random.normal(k_x2, (batch2, input_dim), jnp.float32)
    out2 = jax.block_until_ready(linear_head_padded(x2, *padded, tile_b=64))
    ref2 = _reference(x2, w1, b1, w2, b2)
    assert out2.shape == (batch2, OUT)
    assert jnp.allclose(out2, ref2, atol=2e-4, rtol=2e-4)

    print("KERNEL_OK")
</pallas_src>

<mosaic_0001>
module attributes {stable_mosaic.version = 11 : i64} {
  func.func @linear_head_kernel(%arg0: i32, %arg1: memref<16x32xf32, #tpu.memory_space<vmem>>, %arg2: memref<32x128xf32, #tpu.memory_space<vmem>>, %arg3: memref<1x128xf32, #tpu.memory_space<vmem>>, %arg4: memref<128x128xf32, #tpu.memory_space<vmem>>, %arg5: memref<1x128xf32, #tpu.memory_space<vmem>>, %arg6: memref<16x128xf32, #tpu.memory_space<vmem>>) attributes {dimension_semantics = [#tpu.dimension_semantics<parallel>], iteration_bounds = array<i64: 1>, scalar_prefetch = 0 : i64, scratch_operands = 0 : i64, tpu.core_type = #tpu.core_type<tc>, window_params = [{transform_indices = @transform_0, window_bounds = array<i64: 16, 32>}, {pipeline_mode = #tpu.pipeline_mode<synchronous>, transform_indices = @transform_1, window_bounds = array<i64: 32, 128>}, {pipeline_mode = #tpu.pipeline_mode<synchronous>, transform_indices = @transform_2, window_bounds = array<i64: 1, 128>}, {pipeline_mode = #tpu.pipeline_mode<synchronous>, transform_indices = @transform_3, window_bounds = array<i64: 128, 128>}, {pipeline_mode = #tpu.pipeline_mode<synchronous>, transform_indices = @transform_4, window_bounds = array<i64: 1, 128>}, {transform_indices = @transform_5, window_bounds = array<i64: 16, 128>}]} {
    %c0 = arith.constant 0 : index
    %c0_0 = arith.constant 0 : index
    %0 = vector.load %arg1[%c0, %c0_0] : memref<16x32xf32, #tpu.memory_space<vmem>>, vector<16x32xf32>
    %c0_1 = arith.constant 0 : index
    %c0_2 = arith.constant 0 : index
    %1 = vector.load %arg2[%c0_1, %c0_2] : memref<32x128xf32, #tpu.memory_space<vmem>>, vector<32x128xf32>
    %cst = arith.constant dense<0.000000e+00> : vector<16x128xf32>
    %2 = tpu.matmul %0, %1, %cst {dimension_numbers = #tpu.dot_dimension_numbers<[1], [0], [0], [1], [0, 0, 1, 1], [], []>} : vector<16x32xf32>, vector<32x128xf32>, vector<16x128xf32> -> vector<16x128xf32>
    %c0_3 = arith.constant 0 : index
    %c0_4 = arith.constant 0 : index
    %3 = vector.load %arg3[%c0_3, %c0_4] : memref<1x128xf32, #tpu.memory_space<vmem>>, vector<1x128xf32>
    %4 = vector.broadcast %3 : vector<1x128xf32> to vector<16x128xf32>
    %5 = arith.addf %2, %4 : vector<16x128xf32>
    %cst_5 = arith.constant 0.000000e+00 : f32
    %6 = vector.broadcast %cst_5 : f32 to vector<16x128xf32>
    %7 = arith.maximumf %5, %6 : vector<16x128xf32>
    %c0_6 = arith.constant 0 : index
    %c0_7 = arith.constant 0 : index
    %8 = vector.load %arg4[%c0_6, %c0_7] : memref<128x128xf32, #tpu.memory_space<vmem>>, vector<128x128xf32>
    %cst_8 = arith.constant dense<0.000000e+00> : vector<16x128xf32>
    %9 = tpu.matmul %7, %8, %cst_8 {dimension_numbers = #tpu.dot_dimension_numbers<[1], [0], [0], [1], [0, 0, 1, 1], [], []>} : vector<16x128xf32>, vector<128x128xf32>, vector<16x128xf32> -> vector<16x128xf32>
    %c0_9 = arith.constant 0 : index
    %c0_10 = arith.constant 0 : index
    %10 = vector.load %arg5[%c0_9, %c0_10] : memref<1x128xf32, #tpu.memory_space<vmem>>, vector<1x128xf32>
    %11 = vector.broadcast %10 : vector<1x128xf32> to vector<16x128xf32>
    %12 = arith.addf %9, %11 : vector<16x128xf32>
    %c0_11 = arith.constant 0 : index
    %c0_12 = arith.constant 0 : index
    %13 = vector.load %arg6[%c0_11, %c0_12] : memref<16x128xf32, #tpu.memory_space<vmem>>, vector<16x128xf32>
    tpu.vector_store %arg6[%c0_11, %c0_12], %12 {strides = array<i32>} : memref<16x128xf32, #tpu.memory_space<vmem>>, vector<16x128xf32>,
    return
  }
  func.func @transform_0(%arg0: i32) -> (i32, i32) {
    %c0_i32 = arith.constant 0 : i32
    %c0_i32_0 = arith.constant 0 : i32
    return %arg0, %c0_i32 : i32, i32
  }
  func.func @transform_1(%arg0: i32) -> (i32, i32) {
    %c0_i32 = arith.constant 0 : i32
    %c0_i32_0 = arith.constant 0 : i32
    %c0_i32_1 = arith.constant 0 : i32
    return %c0_i32, %c0_i32_0 : i32, i32
  }
  func.func @transform_2(%arg0: i32) -> (i32, i32) {
    %c0_i32 = arith.constant 0 : i32
    %c0_i32_0 = arith.constant 0 : i32
    %c0_i32_1 = arith.constant 0 : i32
    return %c0_i32, %c0_i32_0 : i32, i32
  }
  func.func @transform_3(%arg0: i32) -> (i32, i32) {
    %c0_i32 = arith.constant 0 : i32
    %c0_i32_0 = arith.constant 0 : i32
    %c0_i32_1 = arith.constant 0 : i32
    return %c0_i32, %c0_i32_0 : i32, i32
  }
  func.func @transform_4(%arg0: i32) -> (i32, i32) {
    %c0_i32 = arith.constant 0 : i32
    %c0_i32_0 = arith.constant 0 : i32
    %c0_i32_1 = arith.constant 0 : i32
    return %c0_i32, %c0_i32_0 : i32, i32
  }
  func.func @transform_5(%arg0: i32) -> (i32, i32) {
    %c0_i32 = arith.constant 0 : i32
    %c0_i32_0 = arith.constant 0 : i32
    return %arg0, %c0_i32 : i32, i32
  }
}

</mosaic_0001>

<bundles_post_ra>
// kernel: linear_head_padded.1
= control target key start
LH: loop header
LB: loop body
LE: loop exit
PB: predicated region body
PF: predicated region fallthrough
CT: control target
= control target key end

     0   :  { %10 = vsyncpa [#allocation3], 0  ;;  %s371_s0 = inlined_call_operand.hbm [shape: f32[16,32], index: 0, kind: input, shape index: {}]   ;;  %s372_s1 = inlined_call_operand.hbm [shape: f32[32,128], index: 1, kind: input, shape index: {}]   ;;  %s373_s2 = inlined_call_operand.vmem [shape: f32[1,128], index: 2, kind: input, shape index: {}]   ;;  %s374_s3 = inlined_call_operand.hbm [shape: f32[128,128], index: 3, kind: input, shape index: {}]   ;;  %s375_s4 = inlined_call_operand.vmem [shape: f32[1,128], index: 4, kind: input, shape index: {}]   ;;  %s376_s5 = inlined_call_operand.hbm [shape: f32[16,128], index: 5, kind: output, shape index: {}]  }
   0x1   :  { %11 = vsyncpa [#allocation6], 0 }
   0x2   :  { %12 = vsyncpa [#allocation4], 0  ;;  %s30_s20 = sshll.u32 %s372_s1, 4  ;;  %s303_s21 = smov [#allocation5]   ;;  %s31_s20 = int_to_ptr.hbm [resolvable:$true] %s30_s20 }
   0x3   :  { %s32_s22 = sshll.u32 %s303_s21, 4  ;;  %s17_s25 = sshll.u32 %s371_s0, 4  ;;  %s33_s22 = int_to_ptr.vmem [resolvable:$true] %s32_s22  ;;  %s18_s25 = int_to_ptr.hbm [resolvable:$true] %s17_s25 }
   0x4   :  { %s304_s26 = smov 128   ;;  %s305_s27 = smov 8  }
   0x5   :  { %38 = dma.hbm_to_vmem [thread:$0]  %s31_s20, 512, %s33_s22, [#allocation6], %s304_s26, %s304_s26, %s305_s27  }
   0x6   :  { %s306_s28 = smov [#allocation2]   ;;  %s45_s1 = sshll.u32 %s374_s3, 4  ;;  %s46_s1 = int_to_ptr.hbm [resolvable:$true] %s45_s1 }
   0x7   :  { %s19_s29 = sshll.u32 %s306_s28, 4  ;;  %s307_s0 = smov [#allocation7]   ;;  %s20_s29 = int_to_ptr.vmem [resolvable:$true] %s19_s29 }
   0x8   :  { %25 = dma.hbm_to_vmem [thread:$0]  %s18_s25, 256, %s20_s29, [#allocation3], %s304_s26, %s304_s26, %s305_s27  }
   0x9   :  { %s47_s7 = sshll.u32 %s307_s0, 4  ;;  %s48_s7 = int_to_ptr.vmem [resolvable:$true] %s47_s7 }
   0xa   :  { %53 = dma.hbm_to_vmem [thread:$0]  %s46_s1, 2048, %s48_s7, [#allocation6], %s304_s26, %s304_s26, %s305_s27  }
   0xb   :  { %297 = dma.done.wait [#allocation3], 256  }
   0xc   :  { %298 = vsyncadd [#allocation3], 4294967040 }
   0xd   :  { %299 = dma.done.wait [#allocation6], 2560  }
   0xe   :  { %300 = vsyncadd [#allocation6], 4294964736  ;;  %v73_v0 = vld [vmem:[#allocation5 + $0x18] sm:$0xff]  ;;  %v72_v1 = vld [vmem:[#allocation5 + $0x10] sm:$0xff]  ;;  %vm78_vm0 = vcmask 261120   ;;  %s308_s11 = smov [#allocation8]  }
   0xf   :  { %97 = vmatpush.msra.mxu0 %v73_v0  ;;  %v71_v2 = vld [vmem:[#allocation5 + $0x8] sm:$0xff]  ;;  %v125_v3 = vld [vmem:[#allocation7 + $0x78] sm:$0xff]  ;;  %v124_v4 = vld [vmem:[#allocation7 + $0x70] sm:$0xff]  ;;  %s159_s12 = sshll.u32 %s308_s11, 4  ;;  %s160_s12 = int_to_ptr.vmem [resolvable:$true] %s159_s12 }
  0x10   :  { %130 = vmatpush.msra.mxu1 %v125_v3  ;;  %v70_v5 = vld [vmem:[#allocation5] sm:$0xff]  ;;  %v123_v6 = vld [vmem:[#allocation7 + $0x68] sm:$0xff]  ;;  %177 = vmatpush.msra.mxu2 %v125_v3  ;;  %v68_v7 = vld [vmem:[#allocation2] sm:$0xff] }
  0x11   :  { %98 = vmatpush.msra.mxu0 %v72_v1  ;;  %v122_v8 = vld [vmem:[#allocation7 + $0x60] sm:$0xff]  ;;  %v121_v9 = vld [vmem:[#allocation7 + $0x58] sm:$0xff]  ;;  %v120_v10 = vld [vmem:[#allocation7 + $0x50] sm:$0xff] }
  0x12   :  { %131 = vmatpush.msra.mxu1 %v124_v4  ;;  %178 = vmatpush.msra.mxu2 %v124_v4  ;;  %v119_v11 = vld [vmem:[#allocation7 + $0x48] sm:$0xff]  ;;  %v69_v12 = vld [vmem:[#allocation2 + $0x8] sm:$0xff]  ;;  %v118_v13 = vld [vmem:[#allocation7 + $0x40] sm:$0xff] }
  0x13   :  { %99 = vmatpush.msra.mxu0 %v71_v2  ;;  %v117_v14 = vld [vmem:[#allocation7 + $0x38] sm:$0xff]  ;;  %v116_v15 = vld [vmem:[#allocation7 + $0x30] sm:$0xff]  ;;  %v115_v16 = vld [vmem:[#allocation7 + $0x28] sm:$0xff] }
  0x14   :  { %132 = vmatpush.msra.mxu1 %v123_v6  ;;  %179 = vmatpush.msra.mxu2 %v123_v6  ;;  %v114_v17 = vld [vmem:[#allocation7 + $0x20] sm:$0xff]  ;;  %v113_v18 = vld [vmem:[#allocation7 + $0x18] sm:$0xff]  ;;  %v112_v19 = vld [vmem:[#allocation7 + $0x10] sm:$0xff] }
  0x15   :  { %100 = vmatpush.msra.mxu0 %v70_v5  ;;  %v111_v20 = vld [vmem:[#allocation7 + $0x8] sm:$0xff]  ;;  %v110_v21 = vld [vmem:[#allocation7] sm:$0xff]  ;;  %v199_v22 = vld [vmem:[%s373_s2] ss:$0 sm:$0xff]  ;;  %s161_s2 = sshll.u32 %s376_s5, 4  ;;  %s162_s2 = int_to_ptr.hbm [resolvable:$true] %s161_s2 }
  0x16   :  { %175 = vmatmul.msk.f32.vlgmr.msra.gmra.mxu0 %vm78_vm0, %v68_v7  ;;  %133 = vmatpush.msra.mxu1 %v122_v8  ;;  %v200_v29 = vld [vmem:[%s375_s4] ss:$0 sm:$0xff] }
  0x17   :  { %180 = vmatpush.msra.mxu2 %v122_v8 }
  0x18   :  { %134 = vmatpush.msra.mxu1 %v121_v9 }
  0x19   :  { %181 = vmatpush.msra.mxu2 %v121_v9 }
  0x1a   :  { %135 = vmatpush.msra.mxu1 %v120_v10 }
  0x1b   :  { %182 = vmatpush.msra.mxu2 %v120_v10 }
  0x1c   :  { %136 = vmatpush.msra.mxu1 %v119_v11 }
  0x1d   :  { %183 = vmatpush.msra.mxu2 %v119_v11 }
  0x1e   :  { %176 = vmatmul.msk.f32.gmra.mxu0 %vm78_vm0, %v69_v12  ;;  %137 = vmatpush.msra.mxu1 %v118_v13 }
  0x1f   :  { %184 = vmatpush.msra.mxu2 %v118_v13 }
  0x20   :  { %138 = vmatpush.msra.mxu1 %v117_v14 }
  0x21   :  { %185 = vmatpush.msra.mxu2 %v117_v14 }
  0x22   :  { %139 = vmatpush.msra.mxu1 %v116_v15 }
  0x23   :  { %186 = vmatpush.msra.mxu2 %v116_v15 }
  0x24   :  { %140 = vmatpush.msra.mxu1 %v115_v16 }
  0x25   :  { %187 = vmatpush.msra.mxu2 %v115_v16 }
  0x26   :  { %141 = vmatpush.msra.mxu1 %v114_v17 }
  0x27   :  { %188 = vmatpush.msra.mxu2 %v114_v17 }
  0x28   :  { %142 = vmatpush.msra.mxu1 %v113_v18 }
  0x29   :  { %189 = vmatpush.msra.mxu2 %v113_v18 }
  0x2a   :  { %143 = vmatpush.msra.mxu1 %v112_v19 }
  0x2b   :  { %190 = vmatpush.msra.mxu2 %v112_v19 }
  0x2c   :  { %144 = vmatpush.msra.mxu1 %v111_v20 }
  0x2d   :  { %191 = vmatpush.msra.mxu2 %v111_v20 }
  0x2e   :  { %145 = vmatpush.msra.mxu1 %v110_v21 }
  0x2f   :  { %192 = vmatpush.msra.mxu2 %v110_v21 }
  0x93   :  { %v102_v23 = vpop.f32.mrf.mxu0 }
  0x94   :  { %v103_v24 = vadd.f32 %v199_v22, %v102_v23 }
  0x96   :  { %v108_v25 = vmax.f32 %v103_v24, 0.0 }
  0x98   :  { %146 = vmatmul.f32.vlgmr.msra.gmra.mxu1 %v108_v25 }
  0x9b   :  { %v105_v26 = vpop.f32.mrf.mxu0 }
  0x9c   :  { %v106_v27 = vadd.f32 %v199_v22, %v105_v26 }
  0x9e   :  { %v109_v28 = vmax.f32 %v106_v27, 0.0 }
  0xa0   :  { %149 = vmatmul.f32.vlgmr.msra.gmra.mxu2 %v109_v28 }
 0x115   :  { %v147_v30 = vpop.f32.mrf.mxu1 }
 0x116   :  { %v148_v31 = vadd.f32 %v200_v29, %v147_v30 }
 0x118   :  { %153 = vst [vmem:[#allocation8] sm:$0xff] %v148_v31 }
 0x123   :  { %v150_v32 = vpop.f32.mrf.mxu2 }
 0x124   :  { %v151_v33 = vadd.f32 %v200_v29, %v150_v32 }
 0x126   :  { %154 = vst [vmem:[#allocation8 + $0x8] sm:$0xff] %v151_v33 }
 0x127   :  { %167 = dma.vmem_to_hbm [thread:$0]  %s160_s12, 256, %s162_s2, [#allocation4], %s304_s26, %s304_s26, %s305_s27  }
 0x128   :  { %301 = dma.done.wait [#allocation4], 256  }
 0x129   :  { %302 = vsyncadd [#allocation4], 4294967040 }
 0x12a   :  { %172 = vsyncpa [#allocation3], 1 }
 0x12b   :  { %173 = vsyncpa [#allocation6], 1 }
 0x12c   :  { %174 = vsyncpa [#allocation4], 1 }

</bundles_post_ra>
